<compile_context>
chip_gen: v5e
topology: v5e:2x2
jax: 0.10.0
libtpu: 0.0.40
codegen_flags: <defaults>
</compile_context>

<pallas_src>
import math
from functools import partial

import jax
import jax.numpy as jnp
from jax.experimental import pallas as pl
from jax.experimental.pallas import tpu as pltpu


def _axial_rope_kernel(sinx_ref, cosx_ref, siny_ref, cosy_ref, sel_ref,
                       sin_ref, cos_ref):
    # sinx_ref/cosx_ref: (TW, 3*dim) bf16   hi/mid/lo split of masked x tables
    # siny_ref/cosy_ref: (1, H*dim)  f32    flattened, masked y tables
    # sel_ref:           (3*dim, H*dim) bf16  0/1 selector (replicates x along H)
    # sin_ref/cos_ref:   (TW, H*dim) f32    lane-dense output blocks
    sel = sel_ref[...]
    sin_ref[...] = (
        jnp.dot(sinx_ref[...], sel, preferred_element_type=jnp.float32)
        + siny_ref[...])
    cos_ref[...] = (
        jnp.dot(cosx_ref[...], sel, preferred_element_type=jnp.float32)
        + cosy_ref[...])


def _choose_w_tile(W, H, dim, per_step_bytes=4 << 20):
    """Largest W tile whose sin+cos f32 output blocks fit the per-step budget
    (blocks are double-buffered by the pipeline).  Prefers multiples of 16
    (bf16 sublane tiling of the input blocks) that divide W."""
    row_bytes = 2 * H * dim * 4            # one w-row of sin + cos, f32
    max_tw = max(1, per_step_bytes // row_bytes)
    if W <= max_tw:
        return W                           # full extent — always legal
    for align in (16, 8):
        start = (max_tw // align) * align
        for cand in range(start, 0, -align):
            if W % cand == 0:
                return cand
    return max(16, (max_tw // 16) * 16)    # ragged tail clipped by Pallas


@partial(jax.jit, static_argnames=("freq_type",))
def axial_rotary_embedding(coords, scales, freq_type="lucidrains"):
    """coords: (B, 2, H, W) float32.  scales: (dim//4,) float32.
    Returns (sin, cos), each (B, W*H, dim) float32 (matches the torch module)."""
    B, two, H, W = coords.shape
    assert two == 2
    d4 = scales.shape[0]
    dim = 4 * d4
    HD = H * dim

    coords = coords.astype(jnp.float32)
    scales = scales.astype(jnp.float32)

    # ---- glue: axial coordinates, exactly like the torch module ----
    seq_x = coords[:, 0, 0, :]                      # (B, W)  "i" axis
    seq_y = coords[:, 1, :, 0]                      # (B, H)  "j" axis
    factor = math.pi if freq_type == "lucidrains" else 1.0

    # Per-output-channel scale, already in the final (d j), j=2 interleaved
    # order; channels [0, dim/2) read the x coordinate, the rest read y.
    k_idx = jnp.arange(dim)
    scale_full = scales[(k_idx // 2) % d4] * factor          # (dim,)
    is_x = k_idx < (dim // 2)                                # (dim,) bool

    # ---- glue: factorized small tables (the only transcendentals) ----
    ang_x = seq_x[:, :, None] * scale_full                   # (B, W, dim)
    ang_y = seq_y[:, :, None] * scale_full                   # (B, H, dim)
    sin_x, cos_x = jnp.sin(ang_x), jnp.cos(ang_x)
    zero = jnp.zeros((), jnp.float32)
    sin_y = jnp.where(is_x, zero, jnp.sin(ang_y)).reshape(B, 1, HD)
    cos_y = jnp.where(is_x, zero, jnp.cos(ang_y)).reshape(B, 1, HD)

    # ---- glue: bf16-exact 3-way split of the x tables (hi/mid/lo), shipped
    # as bf16 so the in-kernel MXU replication is a single exact bf16 pass. ----
    def split3(v):
        hi = v.astype(jnp.bfloat16)
        r1 = v - hi.astype(jnp.float32)
        mid = r1.astype(jnp.bfloat16)
        lo = (r1 - mid.astype(jnp.float32)).astype(jnp.bfloat16)
        return jnp.concatenate([hi, mid, lo], axis=-1)       # (B, W, 3*dim) bf16

    sin_x3 = split3(sin_x)
    cos_x3 = split3(cos_x)

    # 0/1 selector: column (h*dim + k) picks x-channel k (x channels only),
    # replicated for the hi/mid/lo blocks of the contraction axis.
    sel = ((jnp.arange(HD)[None, :] % dim) == k_idx[:, None]) & is_x[:, None]
    sel3 = jnp.tile(sel.astype(jnp.bfloat16), (3, 1))        # (3*dim, HD) bf16

    # ---- kernel launch ----
    TW = _choose_w_tile(W, H, dim)
    n_w = pl.cdiv(W, TW)

    def _nbytes(x):
        return x.size * x.dtype.itemsize

    cost = pl.CostEstimate(
        flops=2 * 2 * B * W * HD * (3 * dim),                # two matmuls
        transcendentals=0,
        bytes_accessed=(_nbytes(sin_x3) + _nbytes(cos_x3) + _nbytes(sin_y)
                        + _nbytes(cos_y) + _nbytes(sel3)
                        + 2 * B * W * HD * 4),
    )

    sin_o, cos_o = pl.pallas_call(
        _axial_rope_kernel,
        out_shape=(jax.ShapeDtypeStruct((B, W, HD), jnp.float32),
                   jax.ShapeDtypeStruct((B, W, HD), jnp.float32)),
        grid_spec=pltpu.PrefetchScalarGridSpec(
            num_scalar_prefetch=0,
            grid=(B, n_w),
            in_specs=[
                pl.BlockSpec((None, TW, 3 * dim), lambda b, w: (b, w, 0)),
                pl.BlockSpec((None, TW, 3 * dim), lambda b, w: (b, w, 0)),
                pl.BlockSpec((None, 1, HD), lambda b, w: (b, 0, 0)),
                pl.BlockSpec((None, 1, HD), lambda b, w: (b, 0, 0)),
                pl.BlockSpec((3 * dim, HD), lambda b, w: (0, 0)),
            ],
            out_specs=[
                pl.BlockSpec((None, TW, HD), lambda b, w: (b, w, 0)),
                pl.BlockSpec((None, TW, HD), lambda b, w: (b, w, 0)),
            ],
        ),
        compiler_params=pltpu.CompilerParams(
            dimension_semantics=("parallel", "parallel")),
        cost_estimate=cost,
    )(sin_x3, cos_x3, sin_y, cos_y, sel3)

    # 'b i (j d) -> b (i j) d' : row-major, metadata-only reshape.
    return sin_o.reshape(B, W * H, dim), cos_o.reshape(B, W * H, dim)


def axial_rotary_embedding_reference(coords, scales, freq_type="lucidrains"):
    """Pure-JAX transliteration of the PyTorch forward, for verification."""
    B, _, H, W = coords.shape
    seq_x = coords[:, 0, 0, :][..., None]   # (B, W, 1)
    seq_y = coords[:, 1, :, 0][..., None]   # (B, H, 1)
    factor = math.pi if freq_type == "lucidrains" else 1.0
    sx = seq_x * scales[None, None, :] * factor   # (B, W, d4)
    sy = seq_y * scales[None, None, :] * factor   # (B, H, d4)
    d4 = scales.shape[0]
    x_sinu = jnp.broadcast_to(sx[:, :, None, :], (B, W, H, d4))
    y_sinu = jnp.broadcast_to(sy[:, None, :, :], (B, W, H, d4))
    sin = jnp.concatenate([jnp.sin(x_sinu), jnp.sin(y_sinu)], axis=-1)
    cos = jnp.concatenate([jnp.cos(x_sinu), jnp.cos(y_sinu)], axis=-1)
    sin = sin.reshape(B, W * H, 2 * d4)
    cos = cos.reshape(B, W * H, 2 * d4)
    sin = jnp.repeat(sin, 2, axis=-1)   # 'b n d -> b n (d j)', j=2
    cos = jnp.repeat(cos, 2, axis=-1)
    return sin, cos


if __name__ == "__main__":
    key = jax.random.PRNGKey(0)
    k1, k2 = jax.random.split(key)

    # Case 1: square spatial grid, 'lucidrains' frequencies.
    B, H, W, dim, max_freq = 2, 16, 16, 32, 10.0
    scales = jnp.linspace(1.0, max_freq / 2.0, dim // 4).astype(jnp.float32)
    coords = jax.random.normal(k1, (B, 2, H, W), dtype=jnp.float32)

    sin, cos = axial_rotary_embedding(coords, scales, freq_type="lucidrains")
    sin = jax.block_until_ready(sin)
    cos = jax.block_until_ready(cos)

    sin_r, cos_r = axial_rotary_embedding_reference(coords, scales, "lucidrains")
    assert sin.shape == (B, W * H, dim) and cos.shape == (B, W * H, dim)
    assert jnp.allclose(sin, sin_r, atol=1e-5, rtol=1e-5)
    assert jnp.allclose(cos, cos_r, atol=1e-5, rtol=1e-5)

    # Case 2: non-square spatial grid, 'vaswani' frequencies.
    B2, H2, W2, dim2 = 2, 8, 16, 32
    scales2 = 1.0 / (10000.0 ** (jnp.arange(0, dim2, 4, dtype=jnp.float32) / dim2))
    coords2 = jax.random.normal(k2, (B2, 2, H2, W2), dtype=jnp.float32)

    sin2, cos2 = axial_rotary_embedding(coords2, scales2, freq_type="vaswani")
    sin2 = jax.block_until_ready(sin2)
    cos2 = jax.block_until_ready(cos2)

    sin2_r, cos2_r = axial_rotary_embedding_reference(coords2, scales2, "vaswani")
    assert sin2.shape == (B2, W2 * H2, dim2)
    assert jnp.allclose(sin2, sin2_r, atol=1e-5, rtol=1e-5)
    assert jnp.allclose(cos2, cos2_r, atol=1e-5, rtol=1e-5)

    print("KERNEL_OK")
</pallas_src>

<mosaic_0001>
module attributes {stable_mosaic.version = 11 : i64} {
  func.func @_axial_rope_kernel(%arg0: i32, %arg1: i32, %arg2: memref<1x16x96xbf16, #tpu.memory_space<vmem>>, %arg3: memref<1x16x96xbf16, #tpu.memory_space<vmem>>, %arg4: memref<1x1x512xf32, #tpu.memory_space<vmem>>, %arg5: memref<1x1x512xf32, #tpu.memory_space<vmem>>, %arg6: memref<96x512xbf16, #tpu.memory_space<vmem>>, %arg7: memref<1x16x512xf32, #tpu.memory_space<vmem>>, %arg8: memref<1x16x512xf32, #tpu.memory_space<vmem>>) attributes {dimension_semantics = [#tpu.dimension_semantics<parallel>, #tpu.dimension_semantics<parallel>], iteration_bounds = array<i64: 2, 1>, scalar_prefetch = 0 : i64, scratch_operands = 0 : i64, tpu.core_type = #tpu.core_type<tc>, window_params = [{transform_indices = @transform_0, window_bounds = array<i64: 1, 16, 96>}, {transform_indices = @transform_1, window_bounds = array<i64: 1, 16, 96>}, {transform_indices = @transform_2, window_bounds = array<i64: 1, 1, 512>}, {transform_indices = @transform_3, window_bounds = array<i64: 1, 1, 512>}, {pipeline_mode = #tpu.pipeline_mode<synchronous>, transform_indices = @transform_4, window_bounds = array<i64: 96, 512>}, {transform_indices = @transform_5, window_bounds = array<i64: 1, 16, 512>}, {transform_indices = @transform_6, window_bounds = array<i64: 1, 16, 512>}]} {
    %c0 = arith.constant 0 : index
    %c0_0 = arith.constant 0 : index
    %0 = vector.load %arg6[%c0, %c0_0] : memref<96x512xbf16, #tpu.memory_space<vmem>>, vector<96x512xbf16>
    %c0_1 = arith.constant 0 : index
    %c0_2 = arith.constant 0 : index
    %c0_3 = arith.constant 0 : index
    %1 = vector.load %arg2[%c0_1, %c0_2, %c0_3] : memref<1x16x96xbf16, #tpu.memory_space<vmem>>, vector<1x16x96xbf16>
    %2 = vector.shape_cast %1 : vector<1x16x96xbf16> to vector<16x96xbf16>
    %cst = arith.constant dense<0.000000e+00> : vector<16x512xf32>
    %3 = tpu.matmul %2, %0, %cst {dimension_numbers = #tpu.dot_dimension_numbers<[1], [0], [0], [1], [0, 0, 1, 1], [], []>} : vector<16x96xbf16>, vector<96x512xbf16>, vector<16x512xf32> -> vector<16x512xf32>
    %c0_4 = arith.constant 0 : index
    %c0_5 = arith.constant 0 : index
    %c0_6 = arith.constant 0 : index
    %4 = vector.load %arg4[%c0_4, %c0_5, %c0_6] : memref<1x1x512xf32, #tpu.memory_space<vmem>>, vector<1x1x512xf32>
    %5 = vector.shape_cast %4 : vector<1x1x512xf32> to vector<1x512xf32>
    %6 = vector.broadcast %5 : vector<1x512xf32> to vector<16x512xf32>
    %7 = arith.addf %3, %6 : vector<16x512xf32>
    %c0_7 = arith.constant 0 : index
    %c0_8 = arith.constant 0 : index
    %c0_9 = arith.constant 0 : index
    %8 = vector.load %arg7[%c0_7, %c0_8, %c0_9] : memref<1x16x512xf32, #tpu.memory_space<vmem>>, vector<1x16x512xf32>
    %9 = vector.shape_cast %8 : vector<1x16x512xf32> to vector<16x512xf32>
    %10 = vector.shape_cast %7 : vector<16x512xf32> to vector<1x16x512xf32>
    tpu.vector_store %arg7[%c0_7, %c0_8, %c0_9], %10 {strides = array<i32>} : memref<1x16x512xf32, #tpu.memory_space<vmem>>, vector<1x16x512xf32>,
    %c0_10 = arith.constant 0 : index
    %c0_11 = arith.constant 0 : index
    %c0_12 = arith.constant 0 : index
    %11 = vector.load %arg3[%c0_10, %c0_11, %c0_12] : memref<1x16x96xbf16, #tpu.memory_space<vmem>>, vector<1x16x96xbf16>
    %12 = vector.shape_cast %11 : vector<1x16x96xbf16> to vector<16x96xbf16>
    %cst_13 = arith.constant dense<0.000000e+00> : vector<16x512xf32>
    %13 = tpu.matmul %12, %0, %cst_13 {dimension_numbers = #tpu.dot_dimension_numbers<[1], [0], [0], [1], [0, 0, 1, 1], [], []>} : vector<16x96xbf16>, vector<96x512xbf16>, vector<16x512xf32> -> vector<16x512xf32>
    %c0_14 = arith.constant 0 : index
    %c0_15 = arith.constant 0 : index
    %c0_16 = arith.constant 0 : index
    %14 = vector.load %arg5[%c0_14, %c0_15, %c0_16] : memref<1x1x512xf32, #tpu.memory_space<vmem>>, vector<1x1x512xf32>
    %15 = vector.shape_cast %14 : vector<1x1x512xf32> to vector<1x512xf32>
    %16 = vector.broadcast %15 : vector<1x512xf32> to vector<16x512xf32>
    %17 = arith.addf %13, %16 : vector<16x512xf32>
    %c0_17 = arith.constant 0 : index
    %c0_18 = arith.constant 0 : index
    %c0_19 = arith.constant 0 : index
    %18 = vector.load %arg8[%c0_17, %c0_18, %c0_19] : memref<1x16x512xf32, #tpu.memory_space<vmem>>, vector<1x16x512xf32>
    %19 = vector.shape_cast %18 : vector<1x16x512xf32> to vector<16x512xf32>
    %20 = vector.shape_cast %17 : vector<16x512xf32> to vector<1x16x512xf32>
    tpu.vector_store %arg8[%c0_17, %c0_18, %c0_19], %20 {strides = array<i32>} : memref<1x16x512xf32, #tpu.memory_space<vmem>>, vector<1x16x512xf32>,
    return
  }
  func.func @transform_0(%arg0: i32, %arg1: i32) -> (i32, i32, i32) {
    %c0_i32 = arith.constant 0 : i32
    %c0_i32_0 = arith.constant 0 : i32
    return %arg0, %arg1, %c0_i32 : i32, i32, i32
  }
  func.func @transform_1(%arg0: i32, %arg1: i32) -> (i32, i32, i32) {
    %c0_i32 = arith.constant 0 : i32
    %c0_i32_0 = arith.constant 0 : i32
    return %arg0, %arg1, %c0_i32 : i32, i32, i32
  }
  func.func @transform_2(%arg0: i32, %arg1: i32) -> (i32, i32, i32) {
    %c0_i32 = arith.constant 0 : i32
    %c0_i32_0 = arith.constant 0 : i32
    %c0_i32_1 = arith.constant 0 : i32
    return %arg0, %c0_i32, %c0_i32_0 : i32, i32, i32
  }
  func.func @transform_3(%arg0: i32, %arg1: i32) -> (i32, i32, i32) {
    %c0_i32 = arith.constant 0 : i32
    %c0_i32_0 = arith.constant 0 : i32
    %c0_i32_1 = arith.constant 0 : i32
    return %arg0, %c0_i32, %c0_i32_0 : i32, i32, i32
  }
  func.func @transform_4(%arg0: i32, %arg1: i32) -> (i32, i32) {
    %c0_i32 = arith.constant 0 : i32
    %c0_i32_0 = arith.constant 0 : i32
    %c0_i32_1 = arith.constant 0 : i32
    return %c0_i32, %c0_i32_0 : i32, i32
  }
  func.func @transform_5(%arg0: i32, %arg1: i32) -> (i32, i32, i32) {
    %c0_i32 = arith.constant 0 : i32
    %c0_i32_0 = arith.constant 0 : i32
    return %arg0, %arg1, %c0_i32 : i32, i32, i32
  }
  func.func @transform_6(%arg0: i32, %arg1: i32) -> (i32, i32, i32) {
    %c0_i32 = arith.constant 0 : i32
    %c0_i32_0 = arith.constant 0 : i32
    return %arg0, %arg1, %c0_i32 : i32, i32, i32
  }
}

</mosaic_0001>

<bundles_post_ra>
// kernel: axial_rotary_embedding.1
= control target key start
LH: loop header
LB: loop body
LE: loop exit
PB: predicated region body
PF: predicated region fallthrough
CT: control target
= control target key end

     0   :  { %s1136_s21 = smov 0   ;;  %s1138_s22 = smov 0   ;;  %s1402_s0 = inlined_call_operand.vmem [shape: bf16[2,16,96], index: 0, kind: input, shape index: {}]   ;;  %s1403_s1 = inlined_call_operand.vmem [shape: bf16[2,16,96], index: 1, kind: input, shape index: {}]   ;;  %s1404_s2 = inlined_call_operand.vmem [shape: f32[2,1,512], index: 2, kind: input, shape index: {}]   ;;  %s1405_s3 = inlined_call_operand.vmem [shape: f32[2,1,512], index: 3, kind: input, shape index: {}]   ;;  %s1406_s4 = inlined_call_operand.vmem [shape: bf16[96,512], index: 4, kind: input, shape index: {}]   ;;  %s1407_s5 = inlined_call_operand.vmem [shape: f32[2,16,512], index: 5, kind: output, shape index: {0}]   ;;  %s1408_s6 = inlined_call_operand.vmem [shape: f32[2,16,512], index: 6, kind: output, shape index: {1}]  }
   0x1   :  { %s1140_s23 = smov 0  }
   0x2 LB: > { %s29_s24 = sadd.s32 1, %s1095_s22  ;;  %p898_p0 = scmp.ge.s32.totalorder %s1099_s23, 1  ;;  %s1099_s23 = sphi %s1140_s23, %s17_s23   ;;  %s1095_s22 = sphi %s1138_s22, %s1410_s22   ;;  %s1091_s21 = sphi %s1136_s21, %s1409_s21  }
   0x3   : > { %p31_p1 = scmp.ge.s32.totalorder %s29_s24, 2  ;;  %p273_p2 = scmp.lt.s32.totalorder %s1099_s23, 3 }
   0x5   : > { %s1412_s24 = smov (%p31_p1, %s29_s24), 0  ;;  %p274_p3 = pnand %p898_p0, %p273_p2 }
   0x6   : > { %p340_p4 = scmp.lt.s32.totalorder (!%p274_p3), %s1091_s21, 1 }
   0x7   : > { %277 = sbr.rel (%p274_p3) target bundleno = 207 (0xcf), region = 40 }
   0xc   : > { %v995_v0 = vld [vmem:[%s1406_s4 + $0xa0] sm:$0xf]  ;;  %v1049_v1 = vld [vmem:[%s1406_s4 + $0xac] sm:$0xf0]  ;;  %v1047_v2 = vld [vmem:[%s1406_s4 + $0xa4] sm:$0xf] }
   0xd   : > { %v1165_v3 = vor.u32 %v1049_v1, %v995_v0  ;;  %v997_v4 = vld [vmem:[%s1406_s4 + $0xb0] sm:$0xf0]  ;;  %v1003_v5 = vld [vmem:[%s1406_s4 + $0xa8] sm:$0xf]  ;;  %v1050_v6 = vld [vmem:[%s1406_s4 + $0xb4] sm:$0xf0] }
   0xe   : > { %v1176_v7 = vor.u32 %v1047_v2, %v997_v4  ;;  %v1178_v8 = vor.u32 %v1050_v6, %v1003_v5  ;;  %v1048_v9 = vld [vmem:[%s1406_s4 + $0xac] sm:$0xf]  ;;  %v1005_v10 = vld [vmem:[%s1406_s4 + $0xb8] sm:$0xf0]  ;;  %v979_v11 = vld [vmem:[%s1406_s4 + $0x80] sm:$0xf] }
   0xf   : > { %557 = vmatpush.bf16.msra.mxu0 %v1165_v3  ;;  %v1190_v12 = vor.u32 %v1048_v9, %v1005_v10  ;;  %v1045_v13 = vld [vmem:[%s1406_s4 + $0x8c] sm:$0xf0]  ;;  %v1043_v14 = vld [vmem:[%s1406_s4 + $0x84] sm:$0xf]  ;;  %v981_v15 = vld [vmem:[%s1406_s4 + $0x90] sm:$0xf0] }
  0x10   : > { %571 = vmatpush.bf16.msra.mxu1 %v1176_v7  ;;  %585 = vmatpush.bf16.msra.mxu2 %v1178_v8  ;;  %v1203_v16 = vor.u32 %v1045_v13, %v979_v11  ;;  %v1205_v17 = vor.u32 %v1043_v14, %v981_v15  ;;  %v987_v18 = vld [vmem:[%s1406_s4 + $0x88] sm:$0xf]  ;;  %v1046_v19 = vld [vmem:[%s1406_s4 + $0x94] sm:$0xf0]  ;;  %v1044_v20 = vld [vmem:[%s1406_s4 + $0x8c] sm:$0xf] }
  0x11   : > { %599 = vmatpush.bf16.msra.mxu3 %v1190_v12  ;;  %v1217_v21 = vor.u32 %v1046_v19, %v987_v18  ;;  %v989_v22 = vld [vmem:[%s1406_s4 + $0x98] sm:$0xf0]  ;;  %v963_v23 = vld [vmem:[%s1406_s4 + $0x60] sm:$0xf]  ;;  %v1041_v24 = vld [vmem:[%s1406_s4 + $0x6c] sm:$0xf0] }
  0x12   : > { %v1228_v25 = vor.u32 %v1044_v20, %v989_v22  ;;  %v1039_v26 = vld [vmem:[%s1406_s4 + $0x64] sm:$0xf]  ;;  %v965_v27 = vld [vmem:[%s1406_s4 + $0x70] sm:$0xf0]  ;;  %v971_v28 = vld [vmem:[%s1406_s4 + $0x68] sm:$0xf]  ;;  %v1240_v29 = vor.u32 %v1041_v24, %v963_v23 }
  0x13   : > { %558 = vmatpush.bf16.msra.mxu0 %v1203_v16  ;;  %v1042_v30 = vld [vmem:[%s1406_s4 + $0x74] sm:$0xf0]  ;;  %v1040_v31 = vld [vmem:[%s1406_s4 + $0x6c] sm:$0xf]  ;;  %v973_v32 = vld [vmem:[%s1406_s4 + $0x78] sm:$0xf0]  ;;  %v1253_v33 = vor.u32 %v1039_v26, %v965_v27 }
  0x14   : > { %572 = vmatpush.bf16.msra.mxu1 %v1205_v17  ;;  %586 = vmatpush.bf16.msra.mxu2 %v1217_v21  ;;  %v1255_v34 = vor.u32 %v1042_v30, %v971_v28  ;;  %v947_v35 = vld [vmem:[%s1406_s4 + $0x40] sm:$0xf]  ;;  %v1037_v36 = vld [vmem:[%s1406_s4 + $0x4c] sm:$0xf0]  ;;  %v1035_v37 = vld [vmem:[%s1406_s4 + $0x44] sm:$0xf]  ;;  %v1267_v38 = vor.u32 %v1040_v31, %v973_v32 }
  0x15   : > { %600 = vmatpush.bf16.msra.mxu3 %v1228_v25  ;;  %v949_v39 = vld [vmem:[%s1406_s4 + $0x50] sm:$0xf0]  ;;  %v955_v40 = vld [vmem:[%s1406_s4 + $0x48] sm:$0xf]  ;;  %v1038_v41 = vld [vmem:[%s1406_s4 + $0x54] sm:$0xf0]  ;;  %v1285_v44 = vor.u32 %v1037_v36, %v947_v35 }
  0x16   : > { %v1036_v42 = vld [vmem:[%s1406_s4 + $0x4c] sm:$0xf]  ;;  %v957_v43 = vld [vmem:[%s1406_s4 + $0x58] sm:$0xf0]  ;;  %v952_v45 = vor.u32 %v1035_v37, %v949_v39  ;;  %v956_v46 = vor.u32 %v1038_v41, %v955_v40  ;;  %v931_v47 = vld [vmem:[%s1406_s4 + $0x20] sm:$0xf] }
  0x17   : > { %559 = vmatpush.bf16.msra.mxu0 %v1240_v29  ;;  %v1033_v48 = vld [vmem:[%s1406_s4 + $0x2c] sm:$0xf0]  ;;  %v1031_v49 = vld [vmem:[%s1406_s4 + $0x24] sm:$0xf]  ;;  %v960_v50 = vor.u32 %v1036_v42, %v957_v43  ;;  %v933_v51 = vld [vmem:[%s1406_s4 + $0x30] sm:$0xf0] }
  0x18   : > { %573 = vmatpush.bf16.msra.mxu1 %v1253_v33  ;;  %587 = vmatpush.bf16.msra.mxu2 %v1255_v34  ;;  %v939_v52 = vld [vmem:[%s1406_s4 + $0x28] sm:$0xf]  ;;  %v1034_v53 = vld [vmem:[%s1406_s4 + $0x34] sm:$0xf0]  ;;  %v1032_v54 = vld [vmem:[%s1406_s4 + $0x2c] sm:$0xf]  ;;  %v932_v56 = vor.u32 %v1033_v48, %v931_v47  ;;  %v936_v58 = vor.u32 %v1031_v49, %v933_v51 }
  0x19   : > { %601 = vmatpush.bf16.msra.mxu3 %v1267_v38  ;;  %v941_v55 = vld [vmem:[%s1406_s4 + $0x38] sm:$0xf0]  ;;  %v915_v57 = vld [vmem:[%s1406_s4] sm:$0xf]  ;;  %v940_v59 = vor.u32 %v1034_v53, %v939_v52  ;;  %v1029_v60 = vld [vmem:[%s1406_s4 + $0xc] sm:$0xf0] }
  0x1a   : > { %v1027_v61 = vld [vmem:[%s1406_s4 + $0x4] sm:$0xf]  ;;  %v944_v62 = vor.u32 %v1032_v54, %v941_v55  ;;  %v917_v63 = vld [vmem:[%s1406_s4 + $0x10] sm:$0xf0]  ;;  %v923_v0 = vld [vmem:[%s1406_s4 + $0x8] sm:$0xf]  ;;  %v916_v5 = vor.u32 %v1029_v60, %v915_v57 }
  0x1b   : > { %560 = vmatpush.bf16.msra.mxu0 %v1285_v44  ;;  %v1030_v1 = vld [vmem:[%s1406_s4 + $0x14] sm:$0xf0]  ;;  %v1028_v2 = vld [vmem:[%s1406_s4 + $0xc] sm:$0xf]  ;;  %v925_v4 = vld [vmem:[%s1406_s4 + $0x18] sm:$0xf0]  ;;  %v920_v6 = vor.u32 %v1027_v61, %v917_v63 }
  0x1c   : > { %574 = vmatpush.bf16.msra.mxu1 %v952_v45  ;;  %588 = vmatpush.bf16.msra.mxu2 %v956_v46  ;;  %s1414_s21 = smov (!%p340_p4, %s1091_s21), 1  ;;  %v924_v9 = vor.u32 %v1030_v1, %v923_v0  ;;  %v928_v10 = vor.u32 %v1028_v2, %v925_v4  ;;  %vm551_vm0 = vcmask 785408  }
  0x1d   : > { %602 = vmatpush.bf16.msra.mxu3 %v960_v50  ;;  %s1023_s17 = sshll.u32 %s1414_s21, 3  ;;  %s903_s28 = sshll.u32 %s1414_s21, 2 }
  0x1e   : > { %s347_s20 = scalar_lea.vmem %s1402_s0, %s1023_s17  ;;  %s357_s27 = scalar_lea.vmem %s1403_s1, %s1023_s17 }
  0x1f   : > { %561 = vmatpush.bf16.msra.mxu0 %v932_v56  ;;  %v1051_v11 = vld [vmem:[%s347_s20] sm:$0xff]  ;;  %s362_s7 = scalar_lea.vmem %s1404_s2, %s903_s28  ;;  %s1025_s8 = sshll.u32 %s1414_s21, 6 }
  0x20   : > { %575 = vmatpush.bf16.msra.mxu1 %v936_v58  ;;  %589 = vmatpush.bf16.msra.mxu2 %v940_v59  ;;  %s376_s11 = scalar_lea.vmem %s1407_s5, %s1025_s8  ;;  %s366_s14 = scalar_lea.vmem %s1405_s3, %s903_s28 }
  0x21   : > { %603 = vmatpush.bf16.msra.mxu3 %v944_v62  ;;  %v621_v30 = vld [vmem:[%s366_s14] sm:$0xf]  ;;  %s387_s17 = scalar_lea.vmem %s1408_s6, %s1025_s8 }
  0x22   : > { %v623_v32 = vperm.slane %v621_v30, 0  ;;  %v626_v39 = vperm.slane %v621_v30, 3 }
  0x23   : > { %562 = vmatpush.bf16.msra.mxu0 %v916_v5 }
  0x24   : > { %576 = vmatpush.bf16.msra.mxu1 %v920_v6  ;;  %590 = vmatpush.bf16.msra.mxu2 %v924_v9 }
  0x25   : > { %604 = vmatpush.bf16.msra.mxu3 %v928_v10 }
  0x26   : > { %1009 = vmatmul.msk.bf16.vlgmr.msra.gmra.mxu0 %vm551_vm0, %v1051_v11 }
  0x27   : > { %641 = vmatpush.bf16.msrb.mxu0 %v1165_v3  ;;  %1011 = vmatmul.msk.bf16.vlgmr.msra.gmra.mxu2 %vm551_vm0, %v1051_v11  ;;  %v1052_v3 = vld [vmem:[%s357_s27] sm:$0xff] }
  0x28   : > { %655 = vmatpush.bf16.msrb.mxu1 %v1176_v7  ;;  %669 = vmatpush.bf16.msrb.mxu2 %v1178_v8  ;;  %v416_v7 = vld [vmem:[%s362_s7] sm:$0xf] }
  0x29   : > { %683 = vmatpush.bf16.msrb.mxu3 %v1190_v12  ;;  %1010 = vmatmul.msk.bf16.vlgmr.msra.gmra.mxu1 %vm551_vm0, %v1051_v11  ;;  %v418_v8 = vperm.slane %v416_v7, 0  ;;  %v419_v12 = vperm.slane %v416_v7, 1  ;;  %v421_v18 = vperm.slane %v416_v7, 3 }
  0x2a   : > { %1012 = vmatmul.msk.bf16.vlgmr.msra.gmra.mxu3 %vm551_vm0, %v1051_v11 }
  0x2b   : > { %642 = vmatpush.bf16.msrb.mxu0 %v1203_v16 }
  0x2c   : > { %656 = vmatpush.bf16.msrb.mxu1 %v1205_v17  ;;  %670 = vmatpush.bf16.msrb.mxu2 %v1217_v21  ;;  %v420_v17 = vperm.slane %v416_v7, 2 }
  0x2d   : > { %684 = vmatpush.bf16.msrb.mxu3 %v1228_v25 }
  0x2f   : > { %643 = vmatpush.bf16.msrb.mxu0 %v1240_v29 }
  0x30   : > { %657 = vmatpush.bf16.msrb.mxu1 %v1253_v33  ;;  %671 = vmatpush.bf16.msrb.mxu2 %v1255_v34  ;;  %v624_v33 = vperm.slane %v621_v30, 1 }
  0x31   : > { %685 = vmatpush.bf16.msrb.mxu3 %v1267_v38  ;;  %v625_v38 = vperm.slane %v621_v30, 2 }
  0x33   : > { %644 = vmatpush.bf16.msrb.mxu0 %v1285_v44 }
  0x34   : > { %658 = vmatpush.bf16.msrb.mxu1 %v952_v45  ;;  %672 = vmatpush.bf16.msrb.mxu2 %v956_v46 }
  0x35   : > { %686 = vmatpush.bf16.msrb.mxu3 %v960_v50 }
  0x37   : > { %645 = vmatpush.bf16.msrb.mxu0 %v932_v56 }
  0x38   : > { %659 = vmatpush.bf16.msrb.mxu1 %v936_v58  ;;  %673 = vmatpush.bf16.msrb.mxu2 %v940_v59 }
  0x39   : > { %687 = vmatpush.bf16.msrb.mxu3 %v944_v62 }
  0x3b   : > { %646 = vmatpush.bf16.msrb.mxu0 %v916_v5 }
  0x3c   : > { %660 = vmatpush.bf16.msrb.mxu1 %v920_v6  ;;  %674 = vmatpush.bf16.msrb.mxu2 %v924_v9 }
  0x3d   : > { %688 = vmatpush.bf16.msrb.mxu3 %v928_v10 }
  0x3e   : > { %1017 = vmatmul.msk.bf16.vlgmr.msrb.gmra.mxu0 %vm551_vm0, %v1052_v3 }
  0x3f   : > { %1018 = vmatmul.msk.bf16.vlgmr.msrb.gmra.mxu1 %vm551_vm0, %v1052_v3  ;;  %1019 = vmatmul.msk.bf16.vlgmr.msrb.gmra.mxu2 %vm551_vm0, %v1052_v3 }
  0x40   : > { %1020 = vmatmul.msk.bf16.vlgmr.msrb.gmra.mxu3 %vm551_vm0, %v1052_v3 }
  0xa3   : > { %v564_v13 = vpop.f32.mrf.mxu0 }
  0xa4   : > { %v565_v14 = vadd.f32 %v564_v13, %v418_v8 }
  0xa6   : > { %v578_v15 = vpop.f32.mrf.mxu1  ;;  %611 = vst [vmem:[%s376_s11] sm:$0xff] %v565_v14 }
  0xa7   : > { %v579_v16 = vadd.f32 %v578_v15, %v419_v12 }
  0xa9   : > { %612 = vst [vmem:[%s376_s11 + $0x8] sm:$0xff] %v579_v16 }
  0xaa   : > { %v592_v19 = vpop.f32.mrf.mxu2 }
  0xab   : > { %v593_v20 = vadd.f32 %v592_v19, %v420_v17  ;;  %v566_v23 = vpop.f32.mrf.mxu0 }
  0xac   : > { %v567_v24 = vadd.f32 %v566_v23, %v418_v8 }
  0xad   : > { %v606_v21 = vpop.f32.mrf.mxu3  ;;  %613 = vst [vmem:[%s376_s11 + $0x10] sm:$0xff] %v593_v20 }
  0xae   : > { %v607_v22 = vadd.f32 %v606_v21, %v421_v18  ;;  %v580_v25 = vpop.f32.mrf.mxu1  ;;  %615 = vst [vmem:[%s376_s11 + $0x20] sm:$0xff] %v567_v24 }
  0xaf   : > { %v581_v26 = vadd.f32 %v580_v25, %v419_v12 }
  0xb0   : > { %614 = vst [vmem:[%s376_s11 + $0x18] sm:$0xff] %v607_v22 }
  0xb1   : > { %616 = vst [vmem:[%s376_s11 + $0x28] sm:$0xff] %v581_v26 }
  0xb2   : > { %v594_v27 = vpop.f32.mrf.mxu2 }
  0xb3   : > { %v595_v28 = vadd.f32 %v594_v27, %v420_v17 }
  0xb5   : > { %v608_v29 = vpop.f32.mrf.mxu3  ;;  %617 = vst [vmem:[%s376_s11 + $0x30] sm:$0xff] %v595_v28 }
  0xb6   : > { %v609_v31 = vadd.f32 %v608_v29, %v421_v18 }
  0xb8   : > { %618 = vst [vmem:[%s376_s11 + $0x38] sm:$0xff] %v609_v31 }
  0xbb   : > { %v648_v34 = vpop.f32.mrf.mxu0 }
  0xbc   : > { %v649_v35 = vadd.f32 %v648_v34, %v623_v32  ;;  %v662_v36 = vpop.f32.mrf.mxu1 }
  0xbd   : > { %v663_v37 = vadd.f32 %v662_v36, %v624_v33 }
  0xbe   : > { %695 = vst [vmem:[%s387_s17] sm:$0xff] %v649_v35 }
  0xbf   : > { %696 = vst [vmem:[%s387_s17 + $0x8] sm:$0xff] %v663_v37 }
  0xc2   : > { %v676_v40 = vpop.f32.mrf.mxu2 }
  0xc3   : > { %v677_v41 = vadd.f32 %v676_v40, %v625_v38  ;;  %v690_v42 = vpop.f32.mrf.mxu3  ;;  %v650_v43 = vpop.f32.mrf.mxu0 }
  0xc4   : > { %v691_v44 = vadd.f32 %v690_v42, %v626_v39  ;;  %v651_v45 = vadd.f32 %v650_v43, %v623_v32  ;;  %v664_v46 = vpop.f32.mrf.mxu1 }
  0xc5   : > { %697 = vst [vmem:[%s387_s17 + $0x10] sm:$0xff] %v677_v41  ;;  %v665_v47 = vadd.f32 %v664_v46, %v624_v33 }
  0xc6   : > { %698 = vst [vmem:[%s387_s17 + $0x18] sm:$0xff] %v691_v44 }
  0xc7   : > { %699 = vst [vmem:[%s387_s17 + $0x20] sm:$0xff] %v651_v45 }
  0xc8   : > { %700 = vst [vmem:[%s387_s17 + $0x28] sm:$0xff] %v665_v47 }
  0xca   : > { %v678_v48 = vpop.f32.mrf.mxu2 }
  0xcb   : > { %v679_v49 = vadd.f32 %v678_v48, %v625_v38  ;;  %v692_v50 = vpop.f32.mrf.mxu3 }
  0xcc   : > { %v693_v51 = vadd.f32 %v692_v50, %v626_v39 }
  0xcd   : > { %701 = vst [vmem:[%s387_s17 + $0x30] sm:$0xff] %v679_v49 }
  0xce   : > { %702 = vst [vmem:[%s387_s17 + $0x38] sm:$0xff] %v693_v51 }
  0xcf PF: > { %s17_s23 = sadd.s32 1, %s1099_s23   ;;  %s1409_s21 = smov %s1095_s22 }
  0xd0   : > { %p14_p5 = scmp.ge.s32.totalorder %s17_s23, 4   ;;  %s1410_s22 = smov %s1412_s24 }
  0xd2   :  { %16 = sbr.rel (!%p14_p5) target bundleno = 2 (0x2), region = 91 }

</bundles_post_ra>
